<compile_context>
chip_gen: v7x
topology: tpu7x:2x2x1
jax: 0.10.0
libtpu: 0.0.40
codegen_flags: <defaults>
</compile_context>

<pallas_src>
import functools

import jax
import jax.numpy as jnp
from jax.experimental import pallas as pl
from jax.experimental.pallas import tpu as pltpu

_NEG_INF = -1e30  # "minus infinity" bias for padded vocab columns (exp() -> 0)


def _round_up(n, m):
    return ((n + m - 1) // m) * m


def _vmem_capacity_bytes():
    try:
        return int(pltpu.get_tpu_info().vmem_capacity_bytes)
    except Exception:
        return 64 << 20  # conservative default (v7x physical VMEM)


def _use_bf16_exp_default():
    # bf16 EUP/VPU exists on v6e/v7x only; keep f32 exp on v5e and older.
    try:
        kind = jax.devices()[0].device_kind.lower()
    except Exception:
        return False
    return ("v6" in kind) or ("v7" in kind)


def _clamp_limit(est_bytes, cap):
    return int(min(max(int(est_bytes * 1.2), 8 << 20), cap))


# --------------------------------------------------------------------------
# Kernels
# --------------------------------------------------------------------------
def _resident_kernel(x_ref, w_ref, b_ref, out_ref, *, exp_dtype):
    # x_ref : (TM, D)   compute_dtype   current row-tile of the flattened input
    # w_ref : (D, Vp)   compute_dtype   full projection weight (resident, 1 buf)
    # b_ref : (1, Vp)   f32             bias (padded cols = -1e30)
    # out_ref:(TM, Vp)  f32             log_softmax(x @ W + b), fixed up in place
    out_ref[...] = (
        jnp.dot(x_ref[...], w_ref[...], preferred_element_type=jnp.float32)
        + b_ref[...]
    )
    logits = out_ref[...]                              # VMEM read-back (cheap)
    m = jnp.max(logits, axis=-1, keepdims=True)
    e = jnp.exp((logits - m).astype(exp_dtype)).astype(jnp.float32)
    lse = m + jnp.log(jnp.sum(e, axis=-1, keepdims=True))
    out_ref[...] = logits - lse


def _vtiled_kernel(x_ref, w_ref, b_ref, logits_ref, lse_ref, m_sc, l_sc, *,
                   exp_dtype):
    # Grid = (rows_p//tm, Vp//tv); V axis is last ("arbitrary").
    # Running max m_sc and denominator l_sc live in VMEM scratch per row-tile.
    j = pl.program_id(1)

    @pl.when(j == 0)
    def _():
        m_sc[...] = jnp.full_like(m_sc, -jnp.inf)
        l_sc[...] = jnp.zeros_like(l_sc)

    logits = (
        jnp.dot(x_ref[...], w_ref[...], preferred_element_type=jnp.float32)
        + b_ref[...]
    )
    logits_ref[...] = logits                           # raw logits for this V block
    m_new = jnp.maximum(m_sc[...], jnp.max(logits, axis=-1, keepdims=True))
    scale = jnp.exp(m_sc[...] - m_new)
    e = jnp.exp((logits - m_new).astype(exp_dtype)).astype(jnp.float32)
    l_sc[...] = scale * l_sc[...] + jnp.sum(e, axis=-1, keepdims=True)
    m_sc[...] = m_new

    @pl.when(j == pl.num_programs(1) - 1)
    def _():
        lse_ref[...] = m_sc[...] + jnp.log(l_sc[...])


def _fixup_kernel(logits_ref, lse_ref, out_ref):
    # Elementwise epilogue: log_softmax = logits - logsumexp(row).
    out_ref[...] = logits_ref[...] - lse_ref[...]


# --------------------------------------------------------------------------
# pallas_call wrappers
# --------------------------------------------------------------------------
def _call_resident(x2, w_p, b_p, tm, exp_dtype, vmem_limit, single_buffer_weights):
    rows_p, D = x2.shape
    Vp = w_p.shape[1]
    pm = {"pipeline_mode": pl.Buffered(1)} if single_buffer_weights else {}
    return pl.pallas_call(
        functools.partial(_resident_kernel, exp_dtype=exp_dtype),
        out_shape=jax.ShapeDtypeStruct((rows_p, Vp), jnp.float32),
        grid_spec=pltpu.PrefetchScalarGridSpec(
            num_scalar_prefetch=0,
            grid=(rows_p // tm,),
            in_specs=[
                pl.BlockSpec((tm, D), lambda i: (i, 0)),          # row tile of x
                pl.BlockSpec((D, Vp), lambda i: (0, 0), **pm),    # resident weight
                pl.BlockSpec((1, Vp), lambda i: (0, 0), **pm),    # resident bias
            ],
            out_specs=pl.BlockSpec((tm, Vp), lambda i: (i, 0)),
        ),
        compiler_params=pltpu.CompilerParams(
            dimension_semantics=("parallel",),
            vmem_limit_bytes=vmem_limit,
        ),
    )(x2, w_p, b_p)


def _call_vtiled(x2, w_p, b_p, tm, tv, exp_dtype, vmem_limit):
    rows_p, D = x2.shape
    Vp = w_p.shape[1]
    return pl.pallas_call(
        functools.partial(_vtiled_kernel, exp_dtype=exp_dtype),
        out_shape=(
            jax.ShapeDtypeStruct((rows_p, Vp), jnp.float32),  # raw logits
            jax.ShapeDtypeStruct((rows_p, 1), jnp.float32),   # per-row logsumexp
        ),
        grid_spec=pltpu.PrefetchScalarGridSpec(
            num_scalar_prefetch=0,
            grid=(rows_p // tm, Vp // tv),
            in_specs=[
                pl.BlockSpec((tm, D), lambda i, j: (i, 0)),
                pl.BlockSpec((D, tv), lambda i, j: (0, j)),   # streamed weight tile
                pl.BlockSpec((1, tv), lambda i, j: (0, j)),
            ],
            out_specs=(
                pl.BlockSpec((tm, tv), lambda i, j: (i, j)),
                pl.BlockSpec((tm, 1), lambda i, j: (i, 0)),   # resident over V axis
            ),
            scratch_shapes=[
                pltpu.VMEM((tm, 1), jnp.float32),             # running max
                pltpu.VMEM((tm, 1), jnp.float32),             # running denominator
            ],
        ),
        compiler_params=pltpu.CompilerParams(
            dimension_semantics=("parallel", "arbitrary"),
            vmem_limit_bytes=vmem_limit,
        ),
    )(x2, w_p, b_p)


def _call_fixup(logits, lse, tm, tv, vmem_limit):
    rows_p, Vp = logits.shape
    return pl.pallas_call(
        _fixup_kernel,
        out_shape=jax.ShapeDtypeStruct((rows_p, Vp), jnp.float32),
        grid_spec=pltpu.PrefetchScalarGridSpec(
            num_scalar_prefetch=0,
            grid=(rows_p // tm, Vp // tv),
            in_specs=[
                pl.BlockSpec((tm, tv), lambda i, j: (i, j)),
                pl.BlockSpec((tm, 1), lambda i, j: (i, 0)),
            ],
            out_specs=pl.BlockSpec((tm, tv), lambda i, j: (i, j)),
        ),
        compiler_params=pltpu.CompilerParams(
            dimension_semantics=("parallel", "parallel"),
            vmem_limit_bytes=vmem_limit,
        ),
    )(logits, lse)


# --------------------------------------------------------------------------
# Public wrapper
# --------------------------------------------------------------------------
def generator_forward(x, w_t, b, *, tm=None, tv=None, force_v_tiled=False,
                      exp_dtype=None, compute_dtype=jnp.bfloat16):
    """x: (B, S, D); w_t: (D, V) (= proj.weight.T); b: (V,). Returns (B, S, V) f32."""
    B, S, D = x.shape
    V = w_t.shape[1]
    rows = B * S
    rows8 = _round_up(max(rows, 1), 8)
    csz = jnp.dtype(compute_dtype).itemsize

    if exp_dtype is None:
        exp_dtype = jnp.bfloat16 if _use_bf16_exp_default() else jnp.float32

    cap = _vmem_capacity_bytes()        # 128 MiB on v5e/v6e, 64 MiB on v7x
    budget = int(cap * 0.8)             # ~20% headroom

    # ---- VMEM accounting (per buffer counts actually requested) ----
    def resident_bytes(t, vpad, w_bufs):
        return (2 * t * D * csz             # x tile, double buffered
                + w_bufs * D * vpad * csz   # weight
                + w_bufs * vpad * 4         # bias (f32)
                + 2 * t * vpad * 4          # f32 out tile, double buffered
                + 2 * t * vpad * 4)         # in-kernel f32 intermediates (estimate)

    def vtiled_bytes(t, tvb):
        return (2 * t * D * csz + 2 * D * tvb * csz + 2 * tvb * 4
                + 2 * t * tvb * 4           # logits out tile
                + 4 * t * 4                 # lse out tile + m/l scratch
                + 2 * t * tvb * 4)          # in-kernel f32 intermediates (estimate)

    # ---- choose path & tiles ----
    vp128 = _round_up(V, 128)
    tm_cands = ([tm] if tm is not None
                else ([t for t in (512, 256, 128) if t <= rows8] or [rows8]))
    resident_tm = next(
        (t for t in tm_cands if resident_bytes(t, vp128, 1) <= budget), None)
    use_resident = (resident_tm is not None) and not force_v_tiled

    if use_resident:
        tm_sel = resident_tm
        vp = vp128
    else:
        tm_sel = tm if tm is not None else min(256, rows8)
        tm_sel = min(_round_up(tm_sel, 8), rows8)
        if tv is None:
            cands = [t for t in (2048, 1024, 512, 256, 128) if t <= vp128] or [128]
            tv = next((t for t in cands if vtiled_bytes(tm_sel, t) <= budget), 128)
        vp = _round_up(V, tv)

    rows_p = _round_up(rows, tm_sel)

    # ---- prepare operands (compute_dtype activations/weights, f32 bias) ----
    x2 = x.reshape(rows, D)
    if rows_p != rows:
        x2 = jnp.zeros((rows_p, D), x2.dtype).at[:rows].set(x2)
    x2 = x2.astype(compute_dtype)

    w_p = w_t.astype(compute_dtype)
    b_p = b.reshape(1, V).astype(jnp.float32)
    if vp != V:
        w_p = jnp.zeros((D, vp), compute_dtype).at[:, :V].set(w_p)
        b_p = jnp.full((1, vp), _NEG_INF, jnp.float32).at[:, :V].set(b_p)

    if use_resident:
        lim1 = _clamp_limit(resident_bytes(tm_sel, vp, 1), cap)
        lim2 = _clamp_limit(resident_bytes(tm_sel, vp, 2), cap)
        try:
            out = _call_resident(x2, w_p, b_p, tm_sel, exp_dtype, lim1,
                                 single_buffer_weights=True)
        except Exception:
            # This jax build rejected pipeline_mode=pl.Buffered(1); fall back to
            # the default double-buffered specs (correctness identical).
            out = _call_resident(x2, w_p, b_p, tm_sel, exp_dtype, lim2,
                                 single_buffer_weights=False)
        if rows_p != rows or vp != V:
            out = out[:rows, :V]
        return out.reshape(B, S, V)

    # ---- V-tiled online-logsumexp path (streamed weight) ----
    lim = _clamp_limit(vtiled_bytes(tm_sel, tv), cap)
    logits, lse = _call_vtiled(x2, w_p, b_p, tm_sel, tv, exp_dtype, lim)
    if rows_p == rows and vp == V:
        lim_fix = _clamp_limit(2 * (2 * tm_sel * tv * 4) + 2 * tm_sel * 4, cap)
        out = _call_fixup(logits, lse, tm_sel, tv, lim_fix)
    else:
        # Fuse the fixup with the un-padding slice in plain JAX (XLA fuses the
        # slice + broadcast-subtract): the true-size output is written once.
        out = logits[:rows, :V] - lse[:rows]
    return out.reshape(B, S, V)


def reference_forward(x, w_t, b, compute_dtype=jnp.bfloat16):
    # Reference uses the same compute_dtype-rounded inputs but plain-JAX f32 math.
    xb = x.astype(compute_dtype).astype(jnp.float32)
    wb = w_t.astype(compute_dtype).astype(jnp.float32)
    logits = jnp.einsum("bsd,dv->bsv", xb, wb,
                        precision=jax.lax.Precision.HIGHEST) + b.astype(jnp.float32)
    return jax.nn.log_softmax(logits, axis=-1)


if __name__ == "__main__":
    key = jax.random.PRNGKey(0)
    kx, kw, kb = jax.random.split(key, 3)

    def make(B, S, D, V):
        x = jax.random.normal(kx, (B, S, D), dtype=jnp.float32)
        w_t = jax.random.normal(kw, (D, V), dtype=jnp.float32) * (1.0 / jnp.sqrt(D))
        b = jax.random.normal(kb, (V,), dtype=jnp.float32) * 0.01
        return x, w_t, b

    def check(out, ref, tol=2e-2):
        # Tolerance covers the deliberate bf16 matmul inputs + bf16 exp on v6e/v7x.
        assert out.shape == ref.shape
        assert jnp.allclose(out, ref, atol=tol, rtol=tol), "mismatch vs reference"
        assert jnp.allclose(jnp.sum(jnp.exp(out), axis=-1), 1.0, atol=tol)

    # 1) Small shapes consistent with the module (d_model=32, vocab=128,
    #    batch=2, seq=8): resident-weight path, no padding, no slice copy.
    x, w_t, b = make(2, 8, 32, 128)
    out = jax.block_until_ready(generator_forward(x, w_t, b))
    check(out, reference_forward(x, w_t, b))

    # 2) Resident path with row / vocab padding (rows=10 -> 16, V=100 -> 128).
    x, w_t, b = make(2, 5, 32, 100)
    out = jax.block_until_ready(generator_forward(x, w_t, b))
    check(out, reference_forward(x, w_t, b))

    # 3) V-tiled online-logsumexp path (forced), vocab multiple of the V tile ->
    #    exercises the Pallas fixup kernel (no padded-output slice).
    x, w_t, b = make(2, 8, 32, 256)
    out = jax.block_until_ready(
        generator_forward(x, w_t, b, force_v_tiled=True, tv=128))
    check(out, reference_forward(x, w_t, b))

    # 4) V-tiled path with vocab padding (V=250 -> 384) -> fused JAX fixup+slice.
    x, w_t, b = make(2, 8, 32, 250)
    out = jax.block_until_ready(
        generator_forward(x, w_t, b, force_v_tiled=True, tv=128))
    check(out, reference_forward(x, w_t, b))

    print("KERNEL_OK")
</pallas_src>

<mosaic_0001>
module attributes {stable_mosaic.version = 11 : i64} {
  func.func @_resident_kernel(%arg0: i32, %arg1: memref<16x32xbf16, #tpu.memory_space<vmem>>, %arg2: memref<32x128xbf16, #tpu.memory_space<vmem>>, %arg3: memref<1x128xf32, #tpu.memory_space<vmem>>, %arg4: memref<16x128xf32, #tpu.memory_space<vmem>>) attributes {dimension_semantics = [#tpu.dimension_semantics<parallel>], iteration_bounds = array<i64: 1>, scalar_prefetch = 0 : i64, scratch_operands = 0 : i64, tpu.core_type = #tpu.core_type<tc>, window_params = [{transform_indices = @transform_0, window_bounds = array<i64: 16, 32>}, {pipeline_mode = #tpu.pipeline_mode<synchronous>, transform_indices = @transform_1, window_bounds = array<i64: 32, 128>}, {pipeline_mode = #tpu.pipeline_mode<synchronous>, transform_indices = @transform_2, window_bounds = array<i64: 1, 128>}, {transform_indices = @transform_3, window_bounds = array<i64: 16, 128>}]} {
    %c0 = arith.constant 0 : index
    %c0_0 = arith.constant 0 : index
    %0 = vector.load %arg1[%c0, %c0_0] : memref<16x32xbf16, #tpu.memory_space<vmem>>, vector<16x32xbf16>
    %c0_1 = arith.constant 0 : index
    %c0_2 = arith.constant 0 : index
    %1 = vector.load %arg2[%c0_1, %c0_2] : memref<32x128xbf16, #tpu.memory_space<vmem>>, vector<32x128xbf16>
    %cst = arith.constant dense<0.000000e+00> : vector<16x128xf32>
    %2 = tpu.matmul %0, %1, %cst {dimension_numbers = #tpu.dot_dimension_numbers<[1], [0], [0], [1], [0, 0, 1, 1], [], []>} : vector<16x32xbf16>, vector<32x128xbf16>, vector<16x128xf32> -> vector<16x128xf32>
    %c0_3 = arith.constant 0 : index
    %c0_4 = arith.constant 0 : index
    %3 = vector.load %arg3[%c0_3, %c0_4] : memref<1x128xf32, #tpu.memory_space<vmem>>, vector<1x128xf32>
    %4 = vector.broadcast %3 : vector<1x128xf32> to vector<16x128xf32>
    %5 = arith.addf %2, %4 : vector<16x128xf32>
    %c0_5 = arith.constant 0 : index
    %c0_6 = arith.constant 0 : index
    %6 = vector.load %arg4[%c0_5, %c0_6] : memref<16x128xf32, #tpu.memory_space<vmem>>, vector<16x128xf32>
    tpu.vector_store %arg4[%c0_5, %c0_6], %5 {strides = array<i32>} : memref<16x128xf32, #tpu.memory_space<vmem>>, vector<16x128xf32>,
    %c0_7 = arith.constant 0 : index
    %c0_8 = arith.constant 0 : index
    %7 = vector.load %arg4[%c0_7, %c0_8] : memref<16x128xf32, #tpu.memory_space<vmem>>, vector<16x128xf32>
    %cst_9 = arith.constant dense<0xFF800000> : vector<16xf32>
    %8 = vector.multi_reduction <maximumf>, %7, %cst_9 [1] : vector<16x128xf32> to vector<16xf32>
    %9 = vector.shape_cast %8 : vector<16xf32> to vector<16x1xf32>
    %10 = vector.broadcast %9 : vector<16x1xf32> to vector<16x128xf32>
    %11 = arith.subf %7, %10 : vector<16x128xf32>
    %12 = math.exp %11 : vector<16x128xf32>
    %cst_10 = arith.constant dense<0.000000e+00> : vector<16xf32>
    %13 = vector.multi_reduction <add>, %12, %cst_10 [1] : vector<16x128xf32> to vector<16xf32>
    %14 = vector.shape_cast %13 : vector<16xf32> to vector<16x1xf32>
    %15 = math.log %14 : vector<16x1xf32>
    %16 = arith.addf %9, %15 : vector<16x1xf32>
    %17 = vector.broadcast %16 : vector<16x1xf32> to vector<16x128xf32>
    %18 = arith.subf %7, %17 : vector<16x128xf32>
    %c0_11 = arith.constant 0 : index
    %c0_12 = arith.constant 0 : index
    %19 = vector.load %arg4[%c0_11, %c0_12] : memref<16x128xf32, #tpu.memory_space<vmem>>, vector<16x128xf32>
    tpu.vector_store %arg4[%c0_11, %c0_12], %18 {strides = array<i32>} : memref<16x128xf32, #tpu.memory_space<vmem>>, vector<16x128xf32>,
    return
  }
  func.func @transform_0(%arg0: i32) -> (i32, i32) {
    %c0_i32 = arith.constant 0 : i32
    %c0_i32_0 = arith.constant 0 : i32
    return %arg0, %c0_i32 : i32, i32
  }
  func.func @transform_1(%arg0: i32) -> (i32, i32) {
    %c0_i32 = arith.constant 0 : i32
    %c0_i32_0 = arith.constant 0 : i32
    %c0_i32_1 = arith.constant 0 : i32
    return %c0_i32, %c0_i32_0 : i32, i32
  }
  func.func @transform_2(%arg0: i32) -> (i32, i32) {
    %c0_i32 = arith.constant 0 : i32
    %c0_i32_0 = arith.constant 0 : i32
    %c0_i32_1 = arith.constant 0 : i32
    return %c0_i32, %c0_i32_0 : i32, i32
  }
  func.func @transform_3(%arg0: i32) -> (i32, i32) {
    %c0_i32 = arith.constant 0 : i32
    %c0_i32_0 = arith.constant 0 : i32
    return %arg0, %c0_i32 : i32, i32
  }
}

module attributes {stable_mosaic.version = 11 : i64} {
  func.func @_resident_kernel(%arg0: i32, %arg1: memref<16x32xbf16, #tpu.memory_space<vmem>>, %arg2: memref<32x128xbf16, #tpu.memory_space<vmem>>, %arg3: memref<1x128xf32, #tpu.memory_space<vmem>>, %arg4: memref<16x128xf32, #tpu.memory_space<vmem>>) attributes {dimension_semantics = [#tpu.dimension_semantics<parallel>], iteration_bounds = array<i64: 1>, scalar_prefetch = 0 : i64, scratch_operands = 0 : i64, tpu.core_type = #tpu.core_type<tc>, window_params = [{transform_indices = @transform_0, window_bounds = array<i64: 16, 32>}, {pipeline_mode = #tpu.pipeline_mode<synchronous>, transform_indices = @transform_1, window_bounds = array<i64: 32, 128>}, {pipeline_mode = #tpu.pipeline_mode<synchronous>, transform_indices = @transform_2, window_bounds = array<i64: 1, 128>}, {transform_indices = @transform_3, window_bounds = array<i64: 16, 128>}]} {
    %c0 = arith.constant 0 : index
    %c0_0 = arith.constant 0 : index
    %0 = vector.load %arg1[%c0, %c0_0] : memref<16x32xbf16, #tpu.memory_space<vmem>>, vector<16x32xbf16>
    %c0_1 = arith.constant 0 : index
    %c0_2 = arith.constant 0 : index
    %1 = vector.load %arg2[%c0_1, %c0_2] : memref<32x128xbf16, #tpu.memory_space<vmem>>, vector<32x128xbf16>
    %cst = arith.constant dense<0.000000e+00> : vector<16x128xf32>
    %2 = tpu.matmul %0, %1, %cst {dimension_numbers = #tpu.dot_dimension_numbers<[1], [0], [0], [1], [0, 0, 1, 1], [], []>} : vector<16x32xbf16>, vector<32x128xbf16>, vector<16x128xf32> -> vector<16x128xf32>
    %c0_3 = arith.constant 0 : index
    %c0_4 = arith.constant 0 : index
    %3 = vector.load %arg3[%c0_3, %c0_4] : memref<1x128xf32, #tpu.memory_space<vmem>>, vector<1x128xf32>
    %4 = vector.broadcast %3 : vector<1x128xf32> to vector<16x128xf32>
    %5 = arith.addf %2, %4 : vector<16x128xf32>
    %c0_5 = arith.constant 0 : index
    %c0_6 = arith.constant 0 : index
    %6 = vector.load %arg4[%c0_5, %c0_6] : memref<16x128xf32, #tpu.memory_space<vmem>>, vector<16x128xf32>
    tpu.vector_store %arg4[%c0_5, %c0_6], %5 {strides = array<i32>} : memref<16x128xf32, #tpu.memory_space<vmem>>, vector<16x128xf32>,
    %c0_7 = arith.constant 0 : index
    %c0_8 = arith.constant 0 : index
    %7 = vector.load %arg4[%c0_7, %c0_8] : memref<16x128xf32, #tpu.memory_space<vmem>>, vector<16x128xf32>
    %cst_9 = arith.constant dense<0xFF800000> : vector<16xf32>
    %8 = vector.multi_reduction <maximumf>, %7, %cst_9 [1] : vector<16x128xf32> to vector<16xf32>
    %9 = vector.shape_cast %8 : vector<16xf32> to vector<16x1xf32>
    %10 = vector.broadcast %9 : vector<16x1xf32> to vector<16x128xf32>
    %11 = arith.subf %7, %10 : vector<16x128xf32>
    %12 = math.exp %11 : vector<16x128xf32>
    %cst_10 = arith.constant dense<0.000000e+00> : vector<16xf32>
    %13 = vector.multi_reduction <add>, %12, %cst_10 [1] : vector<16x128xf32> to vector<16xf32>
    %14 = vector.shape_cast %13 : vector<16xf32> to vector<16x1xf32>
    %15 = math.log %14 : vector<16x1xf32>
    %16 = arith.addf %9, %15 : vector<16x1xf32>
    %17 = vector.broadcast %16 : vector<16x1xf32> to vector<16x128xf32>
    %18 = arith.subf %7, %17 : vector<16x128xf32>
    %c0_11 = arith.constant 0 : index
    %c0_12 = arith.constant 0 : index
    %19 = vector.load %arg4[%c0_11, %c0_12] : memref<16x128xf32, #tpu.memory_space<vmem>>, vector<16x128xf32>
    tpu.vector_store %arg4[%c0_11, %c0_12], %18 {strides = array<i32>} : memref<16x128xf32, #tpu.memory_space<vmem>>, vector<16x128xf32>,
    return
  }
  func.func @transform_0(%arg0: i32) -> (i32, i32) {
    %c0_i32 = arith.constant 0 : i32
    %c0_i32_0 = arith.constant 0 : i32
    return %arg0, %c0_i32 : i32, i32
  }
  func.func @transform_1(%arg0: i32) -> (i32, i32) {
    %c0_i32 = arith.constant 0 : i32
    %c0_i32_0 = arith.constant 0 : i32
    %c0_i32_1 = arith.constant 0 : i32
    return %c0_i32, %c0_i32_0 : i32, i32
  }
  func.func @transform_2(%arg0: i32) -> (i32, i32) {
    %c0_i32 = arith.constant 0 : i32
    %c0_i32_0 = arith.constant 0 : i32
    %c0_i32_1 = arith.constant 0 : i32
    return %c0_i32, %c0_i32_0 : i32, i32
  }
  func.func @transform_3(%arg0: i32) -> (i32, i32) {
    %c0_i32 = arith.constant 0 : i32
    %c0_i32_0 = arith.constant 0 : i32
    return %arg0, %c0_i32 : i32, i32
  }
}

</mosaic_0001>

<bundles_post_ra>
// kernel: tpu_custom_call.1
= control target key start
LH: loop header
LB: loop body
LE: loop exit
PB: predicated region body
PF: predicated region fallthrough
CT: control target
= control target key end

     0   :  { %8 = vsyncpa [#allocation3], 0  ;;  %s341_s0 = inlined_call_operand.hbm [shape: bf16[16,32], index: 0, kind: input, shape index: {}]   ;;  %s342_s1 = inlined_call_operand.hbm [shape: bf16[32,128], index: 1, kind: input, shape index: {}]   ;;  %s343_s2 = inlined_call_operand.vmem [shape: f32[1,128], index: 2, kind: input, shape index: {}]   ;;  %s344_s3 = inlined_call_operand.hbm [shape: f32[16,128], index: 3, kind: output, shape index: {}]  }
   0x1   :  { %9 = vsyncpa [#allocation6], 0 }
   0x2   :  { %10 = vsyncpa [#allocation4], 0  ;;  %s273_s12 = smov [#allocation2]   ;;  %s201_s16 = scalar_lea.hbm %s341_s0, 128 }
   0x3   :  { %s16_s13 = sshll.u32 %s273_s12, 4  ;;  %p202_p0 = scmp.ne.s32.totalorder %s341_s0, %s201_s16  ;;  %s17_s13 = int_to_ptr.vmem [resolvable:$true] %s16_s13 }
   0x4   :  { %p205_p1 = scmp.lt.u32.totalorder %s201_s16, %s341_s0 }
   0x6   :  { %p207_p2 = pnand %p205_p1, %p202_p0 }
   0x8   :  { %210 = shalt.err (!%p207_p2)
}
   0x9   :  { %s211_s21 = scalar_lea.vmem %s17_s13, 128  ;;  %p216_p4 = scmp.lt.s32.totalorder %s17_s13, %s17_s13 }
   0xa   :  { %p212_p3 = scmp.ne.s32.totalorder %s17_s13, %s211_s21  ;;  %p217_p5 = scmp.lt.s32.totalorder %s211_s21, %s211_s21 }
   0xc   :  { %p218_p6 = por %p217_p5, %p216_p4 }
   0xe   :  { %p219_p7 = pnand %p218_p6, %p212_p3 }
  0x10   :  { %222 = shalt.err (!%p219_p7)
}
  0x11   :  { %s274_s22 = smov 64   ;;  %s275_s23 = smov 4  }
  0x12   :  { %22 = dma.hbm_to_vmem [thread:$0]  %s341_s0, 128, %s17_s13, [#allocation3], %s274_s22, %s274_s22, %s275_s23  }
  0x13   :  { %s276_s26 = smov [#allocation5]   ;;  %s223_s30 = scalar_lea.hbm %s342_s1, 256 }
  0x14   :  { %s28_s27 = sshll.u32 %s276_s26, 4  ;;  %p224_p8 = scmp.ne.s32.totalorder %s342_s1, %s223_s30  ;;  %s29_s27 = int_to_ptr.vmem [resolvable:$true] %s28_s27 }
  0x15   :  { %p227_p9 = scmp.lt.u32.totalorder %s223_s30, %s342_s1 }
  0x17   :  { %p229_p10 = pnand %p227_p9, %p224_p8 }
  0x19   :  { %232 = shalt.err (!%p229_p10)
}
  0x1a   :  { %s233_s8 = scalar_lea.vmem %s29_s27, 256  ;;  %p238_p12 = scmp.lt.s32.totalorder %s29_s27, %s29_s27 }
  0x1b   :  { %p234_p11 = scmp.ne.s32.totalorder %s29_s27, %s233_s8  ;;  %p239_p13 = scmp.lt.s32.totalorder %s233_s8, %s233_s8 }
  0x1d   :  { %p240_p0 = por %p239_p13, %p238_p12 }
  0x1f   :  { %p241_p1 = pnand %p240_p0, %p234_p11 }
  0x21   :  { %244 = shalt.err (!%p241_p1)
}
  0x22   :  { %34 = dma.hbm_to_vmem [thread:$0]  %s342_s1, 256, %s29_s27, [#allocation6], %s274_s22, %s274_s22, %s275_s23  }
  0x23   :  { %267 = dma.done.wait [#allocation3], 128  }
  0x24   :  { %268 = vsyncadd [#allocation3], 4294967168 }
  0x25   :  { %269 = dma.done.wait [#allocation6], 256  }
  0x26   :  { %270 = vsyncadd [#allocation6], 4294967040  ;;  %v277_v0 = vmov 0.0   ;;  %vm278_vm0 = vmmov 0   ;;  %v190_v1 = vld [vmem:[#allocation5] sm:$0xff]   ;;  %v191_v2 = vld [vmem:[#allocation5 + $0x8] sm:$0xff]  }
  0x27   :  { %173 = vmatprep.subr.bf16.mxu0 %v277_v0  ;;  %177 = vmatprep.mubr.msk.bf16.mxu0 %vm278_vm0, %v277_v0  ;;  %v192_v3 = vld [vmem:[#allocation2] sm:$0xff]   ;;  %vm74_vm1 = vcmask 261120   ;;  %s279_s1 = smov [#allocation7]  }
  0x28   :  { %174 = vmatpush3.bf16.msra.mxu0 %v190_v1  ;;  %v165_v4 = vld [vmem:[%s343_s2] ss:$0 sm:$0xff]  ;;  %s152_s2 = sshll.u32 %s279_s1, 4  ;;  %s153_s2 = int_to_ptr.vmem [resolvable:$true] %s152_s2 }
  0x29   :  { %175 = vmatprep.subr.bf16.mxu0 %v277_v0  ;;  %s245_s12 = scalar_lea.vmem %s153_s2, 256  ;;  %p250_p3 = scmp.lt.s32.totalorder %s153_s2, %s153_s2 }
  0x2a   :  { %p246_p2 = scmp.ne.s32.totalorder %s153_s2, %s245_s12  ;;  %p251_p4 = scmp.lt.s32.totalorder %s245_s12, %s245_s12 }
  0x2c   :  { %176 = vmatpush3.bf16.msra.mxu0 %v191_v2  ;;  %p252_p5 = por %p251_p4, %p250_p3 }
  0x2e   :  { %p253_p6 = pnand %p252_p5, %p246_p2 }
  0x2f   :  { %178 = vmatmul.mubr.msk.bf16.vlgmr.msra.gmra.mrb[0].mxu0 %vm74_vm1, %v192_v3 }
 0x102   :  { %v112_v5 = vpop.f32.mrb[0].mxu0 }
 0x103   :  { %v113_v6 = vadd.f32 %v165_v4, %v112_v5  ;;  %v179_v7 = vpop.f32.mrb[1].mxu0 }
 0x104   :  { %v115_v8 = vpop.f32.mrb[2].mxu0 }
 0x105   :  { %v180_v9 = vpop.f32.mrb[3].mxu0  ;;  %123 = vmax.xlane.f32.xlu0 %v113_v6  ;;  %v116_v10 = vadd.f32 %v165_v4, %v115_v8 }
 0x109   :  { %125 = vmax.xlane.f32.xlu0 %v116_v10 }
 0x192   :  { %v124_v11 = vpop.xlane.xlu0 %123 }
 0x193   :  { %v127_v12 = vsub.f32 %v113_v6, %v124_v11 }
 0x195   :  { %v129_v13 = vmul.f32 1.442695, %v127_v12 }
 0x196   :  { %v126_v14 = vpop.xlane.xlu0 %125 }
 0x197   :  { %v128_v15 = vsub.f32 %v116_v10, %v126_v14  ;;  %193 = vpow2.f32 %v129_v13 }
 0x199   :  { %v131_v16 = vmul.f32 1.442695, %v128_v15 }
 0x19b   :  { %195 = vpow2.f32 %v131_v16 }
 0x1a1   :  { %v194_v17 = vpop.eup %193 }
 0x1a2   :  { %133 = vadd.xlane.f32.xlu1 %v194_v17 }
 0x1a5   :  { %v196_v18 = vpop.eup %195 }
 0x1a6   :  { %135 = vadd.xlane.f32.xlu1 %v196_v18 }
 0x22f   :  { %v134_v19 = vpop.xlane.xlu1 %133 }
 0x230   :  { %197 = vlog2.f32 %v134_v19 }
 0x233   :  { %v136_v20 = vpop.xlane.xlu1 %135 }
 0x234   :  { %199 = vlog2.f32 %v136_v20 }
 0x23a   :  { %v198_v21 = vpop.eup %197 }
 0x23b   :  { %v138_v22 = vmul.f32 0.6931472, %v198_v21 }
 0x23d   :  { %v141_v23 = vadd.f32 %v138_v22, %v124_v11 }
 0x23e   :  { %v200_v24 = vpop.eup %199 }
 0x23f   :  { %v143_v25 = vsub.f32 %v113_v6, %v141_v23  ;;  %v140_v26 = vmul.f32 0.6931472, %v200_v24 }
 0x241   :  { %145 = vst [vmem:[#allocation7] sm:$0xff] %v143_v25  ;;  %v142_v27 = vadd.f32 %v140_v26, %v126_v14 }
 0x243   :  { %v144_v28 = vsub.f32 %v116_v10, %v142_v27 }
 0x245   :  { %146 = vst [vmem:[#allocation7 + $0x8] sm:$0xff] %v144_v28 }
 0x246   :  { %256 = shalt.err (!%p253_p6)
}
 0x247   :  { %s257_s15 = scalar_lea.hbm %s344_s3, 256 }
 0x248   :  { %p258_p7 = scmp.ne.s32.totalorder %s344_s3, %s257_s15  ;;  %p261_p8 = scmp.lt.u32.totalorder %s257_s15, %s344_s3 }
 0x24a   :  { %p263_p9 = pnand %p261_p8, %p258_p7 }
 0x24c   :  { %266 = shalt.err (!%p263_p9)
}
 0x24d   :  { %s280_s20 = smov 128   ;;  %s281_s21 = smov 8  }
 0x24e   :  { %158 = dma.vmem_to_hbm [thread:$0]  %s153_s2, 256, %s344_s3, [#allocation4], %s280_s20, %s280_s20, %s281_s21  }
 0x24f   :  { %271 = dma.done.wait [#allocation4], 256  }
 0x250   :  { %272 = vsyncadd [#allocation4], 4294967040 }
 0x251   :  { %162 = vsyncpa [#allocation3], 1 }
 0x252   :  { %163 = vsyncpa [#allocation6], 1 }
 0x253   :  { %164 = vsyncpa [#allocation4], 1 }

// kernel: tpu_custom_call.1
= control target key start
LH: loop header
LB: loop body
LE: loop exit
PB: predicated region body
PF: predicated region fallthrough
CT: control target
= control target key end

     0   :  { %8 = vsyncpa [#allocation3], 0  ;;  %s341_s0 = inlined_call_operand.hbm [shape: bf16[16,32], index: 0, kind: input, shape index: {}]   ;;  %s342_s1 = inlined_call_operand.hbm [shape: bf16[32,128], index: 1, kind: input, shape index: {}]   ;;  %s343_s2 = inlined_call_operand.vmem [shape: f32[1,128], index: 2, kind: input, shape index: {}]   ;;  %s344_s3 = inlined_call_operand.hbm [shape: f32[16,128], index: 3, kind: output, shape index: {}]  }
   0x1   :  { %9 = vsyncpa [#allocation6], 0 }
   0x2   :  { %10 = vsyncpa [#allocation4], 0  ;;  %s273_s12 = smov [#allocation2]   ;;  %s201_s16 = scalar_lea.hbm %s341_s0, 128 }
   0x3   :  { %s16_s13 = sshll.u32 %s273_s12, 4  ;;  %p202_p0 = scmp.ne.s32.totalorder %s341_s0, %s201_s16  ;;  %s17_s13 = int_to_ptr.vmem [resolvable:$true] %s16_s13 }
   0x4   :  { %p205_p1 = scmp.lt.u32.totalorder %s201_s16, %s341_s0 }
   0x6   :  { %p207_p2 = pnand %p205_p1, %p202_p0 }
   0x8   :  { %210 = shalt.err (!%p207_p2)
}
   0x9   :  { %s211_s21 = scalar_lea.vmem %s17_s13, 128  ;;  %p216_p4 = scmp.lt.s32.totalorder %s17_s13, %s17_s13 }
   0xa   :  { %p212_p3 = scmp.ne.s32.totalorder %s17_s13, %s211_s21  ;;  %p217_p5 = scmp.lt.s32.totalorder %s211_s21, %s211_s21 }
   0xc   :  { %p218_p6 = por %p217_p5, %p216_p4 }
   0xe   :  { %p219_p7 = pnand %p218_p6, %p212_p3 }
  0x10   :  { %222 = shalt.err (!%p219_p7)
}
  0x11   :  { %s274_s22 = smov 64   ;;  %s275_s23 = smov 4  }
  0x12   :  { %22 = dma.hbm_to_vmem [thread:$0]  %s341_s0, 128, %s17_s13, [#allocation3], %s274_s22, %s274_s22, %s275_s23  }
  0x13   :  { %s276_s26 = smov [#allocation5]   ;;  %s223_s30 = scalar_lea.hbm %s342_s1, 256 }
  0x14   :  { %s28_s27 = sshll.u32 %s276_s26, 4  ;;  %p224_p8 = scmp.ne.s32.totalorder %s342_s1, %s223_s30  ;;  %s29_s27 = int_to_ptr.vmem [resolvable:$true] %s28_s27 }
  0x15   :  { %p227_p9 = scmp.lt.u32.totalorder %s223_s30, %s342_s1 }
  0x17   :  { %p229_p10 = pnand %p227_p9, %p224_p8 }
  0x19   :  { %232 = shalt.err (!%p229_p10)
}
  0x1a   :  { %s233_s8 = scalar_lea.vmem %s29_s27, 256  ;;  %p238_p12 = scmp.lt.s32.totalorder %s29_s27, %s29_s27 }
  0x1b   :  { %p234_p11 = scmp.ne.s32.totalorder %s29_s27, %s233_s8  ;;  %p239_p13 = scmp.lt.s32.totalorder %s233_s8, %s233_s8 }
  0x1d   :  { %p240_p0 = por %p239_p13, %p238_p12 }
  0x1f   :  { %p241_p1 = pnand %p240_p0, %p234_p11 }
  0x21   :  { %244 = shalt.err (!%p241_p1)
}
  0x22   :  { %34 = dma.hbm_to_vmem [thread:$0]  %s342_s1, 256, %s29_s27, [#allocation6], %s274_s22, %s274_s22, %s275_s23  }
  0x23   :  { %267 = dma.done.wait [#allocation3], 128  }
  0x24   :  { %268 = vsyncadd [#allocation3], 4294967168 }
  0x25   :  { %269 = dma.done.wait [#allocation6], 256  }
  0x26   :  { %270 = vsyncadd [#allocation6], 4294967040  ;;  %v277_v0 = vmov 0.0   ;;  %vm278_vm0 = vmmov 0   ;;  %v190_v1 = vld [vmem:[#allocation5] sm:$0xff]   ;;  %v191_v2 = vld [vmem:[#allocation5 + $0x8] sm:$0xff]  }
  0x27   :  { %173 = vmatprep.subr.bf16.mxu0 %v277_v0  ;;  %177 = vmatprep.mubr.msk.bf16.mxu0 %vm278_vm0, %v277_v0  ;;  %v192_v3 = vld [vmem:[#allocation2] sm:$0xff]   ;;  %vm74_vm1 = vcmask 261120   ;;  %s279_s1 = smov [#allocation7]  }
  0x28   :  { %174 = vmatpush3.bf16.msra.mxu0 %v190_v1  ;;  %v165_v4 = vld [vmem:[%s343_s2] ss:$0 sm:$0xff]  ;;  %s152_s2 = sshll.u32 %s279_s1, 4  ;;  %s153_s2 = int_to_ptr.vmem [resolvable:$true] %s152_s2 }
  0x29   :  { %175 = vmatprep.subr.bf16.mxu0 %v277_v0  ;;  %s245_s12 = scalar_lea.vmem %s153_s2, 256  ;;  %p250_p3 = scmp.lt.s32.totalorder %s153_s2, %s153_s2 }
  0x2a   :  { %p246_p2 = scmp.ne.s32.totalorder %s153_s2, %s245_s12  ;;  %p251_p4 = scmp.lt.s32.totalorder %s245_s12, %s245_s12 }
  0x2c   :  { %176 = vmatpush3.bf16.msra.mxu0 %v191_v2  ;;  %p252_p5 = por %p251_p4, %p250_p3 }
  0x2e   :  { %p253_p6 = pnand %p252_p5, %p246_p2 }
  0x2f   :  { %178 = vmatmul.mubr.msk.bf16.vlgmr.msra.gmra.mrb[0].mxu0 %vm74_vm1, %v192_v3 }
 0x102   :  { %v112_v5 = vpop.f32.mrb[0].mxu0 }
 0x103   :  { %v113_v6 = vadd.f32 %v165_v4, %v112_v5  ;;  %v179_v7 = vpop.f32.mrb[1].mxu0 }
 0x104   :  { %v115_v8 = vpop.f32.mrb[2].mxu0 }
 0x105   :  { %v180_v9 = vpop.f32.mrb[3].mxu0  ;;  %123 = vmax.xlane.f32.xlu0 %v113_v6  ;;  %v116_v10 = vadd.f32 %v165_v4, %v115_v8 }
 0x109   :  { %125 = vmax.xlane.f32.xlu0 %v116_v10 }
 0x192   :  { %v124_v11 = vpop.xlane.xlu0 %123 }
 0x193   :  { %v127_v12 = vsub.f32 %v113_v6, %v124_v11 }
 0x195   :  { %v129_v13 = vmul.f32 1.442695, %v127_v12 }
 0x196   :  { %v126_v14 = vpop.xlane.xlu0 %125 }
 0x197   :  { %v128_v15 = vsub.f32 %v116_v10, %v126_v14  ;;  %193 = vpow2.f32 %v129_v13 }
 0x199   :  { %v131_v16 = vmul.f32 1.442695, %v128_v15 }
 0x19b   :  { %195 = vpow2.f32 %v131_v16 }
 0x1a1   :  { %v194_v17 = vpop.eup %193 }
 0x1a2   :  { %133 = vadd.xlane.f32.xlu1 %v194_v17 }
 0x1a5   :  { %v196_v18 = vpop.eup %195 }
 0x1a6   :  { %135 = vadd.xlane.f32.xlu1 %v196_v18 }
 0x22f   :  { %v134_v19 = vpop.xlane.xlu1 %133 }
 0x230   :  { %197 = vlog2.f32 %v134_v19 }
 0x233   :  { %v136_v20 = vpop.xlane.xlu1 %135 }
 0x234   :  { %199 = vlog2.f32 %v136_v20 }
 0x23a   :  { %v198_v21 = vpop.eup %197 }
 0x23b   :  { %v138_v22 = vmul.f32 0.6931472, %v198_v21 }
 0x23d   :  { %v141_v23 = vadd.f32 %v138_v22, %v124_v11 }
 0x23e   :  { %v200_v24 = vpop.eup %199 }
 0x23f   :  { %v143_v25 = vsub.f32 %v113_v6, %v141_v23  ;;  %v140_v26 = vmul.f32 0.6931472, %v200_v24 }
 0x241   :  { %145 = vst [vmem:[#allocation7] sm:$0xff] %v143_v25  ;;  %v142_v27 = vadd.f32 %v140_v26, %v126_v14 }
 0x243   :  { %v144_v28 = vsub.f32 %v116_v10, %v142_v27 }
 0x245   :  { %146 = vst [vmem:[#allocation7 + $0x8] sm:$0xff] %v144_v28 }
 0x246   :  { %256 = shalt.err (!%p253_p6)
}
 0x247   :  { %s257_s15 = scalar_lea.hbm %s344_s3, 256 }
 0x248   :  { %p258_p7 = scmp.ne.s32.totalorder %s344_s3, %s257_s15  ;;  %p261_p8 = scmp.lt.u32.totalorder %s257_s15, %s344_s3 }
 0x24a   :  { %p263_p9 = pnand %p261_p8, %p258_p7 }
 0x24c   :  { %266 = shalt.err (!%p263_p9)
}
 0x24d   :  { %s280_s20 = smov 128   ;;  %s281_s21 = smov 8  }
 0x24e   :  { %158 = dma.vmem_to_hbm [thread:$0]  %s153_s2, 256, %s344_s3, [#allocation4], %s280_s20, %s280_s20, %s281_s21  }
 0x24f   :  { %271 = dma.done.wait [#allocation4], 256  }
 0x250   :  { %272 = vsyncadd [#allocation4], 4294967040 }
 0x251   :  { %162 = vsyncpa [#allocation3], 1 }
 0x252   :  { %163 = vsyncpa [#allocation6], 1 }
 0x253   :  { %164 = vsyncpa [#allocation4], 1 }

</bundles_post_ra>
